<compile_context>
chip_gen: v7x
topology: tpu7x:2x2x1
jax: 0.10.0
libtpu: 0.0.40
codegen_flags: <defaults>
</compile_context>

<pallas_src>
import functools
import math

import jax
import jax.numpy as jnp
from jax.experimental import pallas as pl
from jax.experimental.pallas import tpu as pltpu


def _round_up(x, m):
    return ((x + m - 1) // m) * m


def _divisor_tile(total, max_tile, prefer_split=False):
    """Largest multiple-of-128 divisor of `total` that is <= max_tile.

    If prefer_split, avoid a single tile covering the whole axis (so the
    megacore-parallel grid axis has >= 2 tiles) whenever total > 128.
    """
    assert total % 128 == 0
    m = total // 128
    best = 128
    for d in range(1, m + 1):
        if m % d != 0:
            continue
        t = 128 * d
        if t > max_tile:
            break
        if prefer_split and t == total and m > 1:
            continue
        best = t
    return best


def _pick_tk(in_pad, tn, b_pad, w_bytes, n_weight_streams, budget_bytes):
    """Largest multiple-of-128 divisor of in_pad whose working set fits the budget."""
    m = in_pad // 128
    best = 128
    for d in range(1, m + 1):
        if m % d != 0:
            continue
        tk = 128 * d
        vmem = (
            n_weight_streams * 2 * tk * tn * w_bytes   # double-buffered weight streams
            + 2 * b_pad * tk * 4                       # x block (double-buffered)
            + 2 * b_pad * tn * 4                       # output block
            + 2 * 8 * tk * 4 + 4 * 2 * 8 * tn * 4      # small row vectors (padded sublanes)
        )
        if vmem <= budget_bytes:
            best = tk
    return best


# ----------------------------- Pallas kernels -------------------------------


def _noisy_linear_train_kernel(
    x_ref,        # [B_pad, tk]   f32
    eps_in_ref,   # [1, tk]       f32
    wmu_ref,      # [tk, tn]      matmul_dtype
    wsig_ref,     # [tk, tn]      matmul_dtype
    eps_out_ref,  # [1, tn]       f32
    bmu_ref,      # [1, tn]       f32
    bsig_ref,     # [1, tn]       f32
    beps_ref,     # [1, tn]       f32
    o_ref,        # [B_pad, tn]   f32 (resident across the k axis -> accumulator)
    *,
    matmul_dtype,
):
    k = pl.program_id(1)

    @pl.when(k == 0)
    def _():
        o_ref[...] = jnp.zeros_like(o_ref)

    x_blk = x_ref[...]
    y_mu = jnp.dot(
        x_blk.astype(matmul_dtype), wmu_ref[...],
        preferred_element_type=jnp.float32,
    )
    y_sig = jnp.dot(
        (x_blk * eps_in_ref[...]).astype(matmul_dtype), wsig_ref[...],
        preferred_element_type=jnp.float32,
    )
    o_ref[...] += y_mu + y_sig * eps_out_ref[...]

    @pl.when(k == pl.num_programs(1) - 1)
    def _():
        o_ref[...] += bmu_ref[...] + bsig_ref[...] * beps_ref[...]


def _noisy_linear_eval_kernel(x_ref, wmu_ref, bmu_ref, o_ref, *, matmul_dtype):
    k = pl.program_id(1)

    @pl.when(k == 0)
    def _():
        o_ref[...] = jnp.zeros_like(o_ref)

    o_ref[...] += jnp.dot(
        x_ref[...].astype(matmul_dtype), wmu_ref[...],
        preferred_element_type=jnp.float32,
    )

    @pl.when(k == pl.num_programs(1) - 1)
    def _():
        o_ref[...] += bmu_ref[...]


# ----------------------------- Python wrapper --------------------------------


def noisy_linear_forward(
    x, params, *, training=True, tn_max=512, vmem_budget_bytes=24 * 1024 * 1024
):
    """NoisyLinear forward.

    x: [B, in_features] float32
    params (from init_noisy_linear):
      weight_mu, weight_sigma : [in_pad, out_pad], pre-padded, stored dtype = matmul dtype
      eps_in [in_features], eps_out [out_features]            (factorized noise, f32)
      bias_mu, bias_sigma, bias_epsilon [out_features]        (f32)
      in_features, out_features : python ints (logical sizes)
    """
    B, in_features = x.shape
    assert in_features == params["in_features"]
    out_features = params["out_features"]

    wmu = params["weight_mu"]
    in_pad, out_pad = wmu.shape
    matmul_dtype = wmu.dtype
    w_bytes = jnp.dtype(matmul_dtype).itemsize

    B_pad = max(_round_up(B, 8), 8)
    x_p = jnp.pad(x, ((0, B_pad - B), (0, in_pad - in_features)))

    tn = _divisor_tile(out_pad, tn_max, prefer_split=True)
    n_streams = 2 if training else 1
    tk = _pick_tk(in_pad, tn, B_pad, w_bytes, n_streams, vmem_budget_bytes)
    grid = (out_pad // tn, in_pad // tk)   # (out-tiles, k-tiles); reduction last

    def out_row(v):
        v = v.astype(jnp.float32)
        return jnp.pad(v, (0, out_pad - v.shape[0])).reshape(1, out_pad)

    # In the common full-K case (tk == in_pad) the x / eps_in block index is constant,
    # so they are DMA'd once and stay resident in VMEM.
    # TODO(synk): for huge-K layers a fully resident x (in-kernel pl.ds over a
    # (B_pad, in_pad) block) would drop one small DMA descriptor per k step.
    x_spec = pl.BlockSpec((B_pad, tk), lambda j, k: (0, k))
    ein_spec = pl.BlockSpec((1, tk), lambda j, k: (0, k))
    w_spec = pl.BlockSpec((tk, tn), lambda j, k: (k, j))
    row_spec = pl.BlockSpec((1, tn), lambda j, k: (0, j))
    out_spec = pl.BlockSpec((B_pad, tn), lambda j, k: (0, j))

    common = dict(
        out_shape=jax.ShapeDtypeStruct((B_pad, out_pad), jnp.float32),
        grid=grid,
        out_specs=out_spec,
        compiler_params=pltpu.CompilerParams(
            dimension_semantics=("parallel", "arbitrary"),
            vmem_limit_bytes=32 * 1024 * 1024,
        ),
    )

    if training:
        eps_in_row = jnp.pad(
            params["eps_in"].astype(jnp.float32), (0, in_pad - in_features)
        ).reshape(1, in_pad)
        y_p = pl.pallas_call(
            functools.partial(_noisy_linear_train_kernel, matmul_dtype=matmul_dtype),
            in_specs=[x_spec, ein_spec, w_spec, w_spec,
                      row_spec, row_spec, row_spec, row_spec],
            **common,
        )(
            x_p, eps_in_row, wmu, params["weight_sigma"],
            out_row(params["eps_out"]), out_row(params["bias_mu"]),
            out_row(params["bias_sigma"]), out_row(params["bias_epsilon"]),
        )
    else:
        y_p = pl.pallas_call(
            functools.partial(_noisy_linear_eval_kernel, matmul_dtype=matmul_dtype),
            in_specs=[x_spec, w_spec, row_spec],
            **common,
        )(x_p, wmu, out_row(params["bias_mu"]))

    return y_p[:B, :out_features]


# ------------------------ Deterministic parameter init -----------------------


def _scale_noise(key, size):
    v = jax.random.normal(key, (size,), dtype=jnp.float32)
    return jnp.sign(v) * jnp.sqrt(jnp.abs(v))


def init_noisy_linear(key, in_features, out_features, std_init=0.5,
                      weight_dtype=jnp.bfloat16):
    """Reproduces reset_parameters()/reset_noise() semantics.

    Weights are stored pre-transposed ([in, out]), pre-padded to 128-multiples
    and cast once to `weight_dtype` (bf16 by default) so the forward never
    pads/copies/casts the weights in HBM. Noise is kept factorized
    (eps_in, eps_out) instead of the dense weight_epsilon buffer.
    """
    k_wmu, k_bmu, k_ein, k_eout, k_beps = jax.random.split(key, 5)
    mu_range = 1.0 / math.sqrt(in_features)
    in_pad = _round_up(in_features, 128)
    out_pad = _round_up(out_features, 128)

    weight_mu = jax.random.uniform(
        k_wmu, (in_features, out_features), jnp.float32, -mu_range, mu_range
    )
    weight_sigma = jnp.full(
        (in_features, out_features), std_init / math.sqrt(in_features), jnp.float32
    )

    def pad_w(w):
        return jnp.pad(
            w, ((0, in_pad - in_features), (0, out_pad - out_features))
        ).astype(weight_dtype)

    return {
        "weight_mu": pad_w(weight_mu),
        "weight_sigma": pad_w(weight_sigma),
        "eps_in": _scale_noise(k_ein, in_features),
        "eps_out": _scale_noise(k_eout, out_features),
        "bias_mu": jax.random.uniform(
            k_bmu, (out_features,), jnp.float32, -mu_range, mu_range
        ),
        "bias_sigma": jnp.full(
            (out_features,), std_init / math.sqrt(out_features), jnp.float32
        ),
        "bias_epsilon": _scale_noise(k_beps, out_features),
        "in_features": in_features,
        "out_features": out_features,
    }


# ------------------------------ Reference (JAX) -------------------------------


def noisy_linear_ref(x, p, training=True):
    in_f, out_f = p["in_features"], p["out_features"]
    wmu = p["weight_mu"][:in_f, :out_f].astype(jnp.float32)
    if training:
        wsig = p["weight_sigma"][:in_f, :out_f].astype(jnp.float32)
        w = wmu + wsig * jnp.outer(p["eps_in"], p["eps_out"])
        b = p["bias_mu"] + p["bias_sigma"] * p["bias_epsilon"]
    else:
        w, b = wmu, p["bias_mu"]
    return x @ w + b


# ----------------------------------- main -------------------------------------

if __name__ == "__main__":
    key = jax.random.PRNGKey(0)
    k_p1, k_p2, k_x1, k_x2 = jax.random.split(key, 4)

    # Case 1: multi-out-tile shapes with bf16 weights (out_pad=384 -> tn=128, 3 tiles;
    # in_pad=512 fits full-K, so the k axis is a single pipelined step).
    B, in_f, out_f = 16, 512, 384
    params = init_noisy_linear(k_p1, in_f, out_f, std_init=0.5)
    x = jax.random.normal(k_x1, (B, in_f), dtype=jnp.float32)

    y_train = jax.block_until_ready(noisy_linear_forward(x, params, training=True))
    y_eval = jax.block_until_ready(noisy_linear_forward(x, params, training=False))

    ref_train = noisy_linear_ref(x, params, training=True)
    ref_eval = noisy_linear_ref(x, params, training=False)
    assert jnp.allclose(y_train, ref_train, atol=3e-2, rtol=3e-2)
    assert jnp.allclose(y_eval, ref_eval, atol=3e-2, rtol=3e-2)

    # Case 2: tiny RL-style shapes with f32 weights (debug path, exercises padding
    # out=16 -> 128 and the single-tile grid).
    B2, in2, out2 = 8, 32, 16
    params2 = init_noisy_linear(k_p2, in2, out2, std_init=0.5,
                                weight_dtype=jnp.float32)
    x2 = jax.random.normal(k_x2, (B2, in2), dtype=jnp.float32)
    y2_train = jax.block_until_ready(noisy_linear_forward(x2, params2, training=True))
    y2_eval = jax.block_until_ready(noisy_linear_forward(x2, params2, training=False))
    assert jnp.allclose(y2_train, noisy_linear_ref(x2, params2, True), atol=1e-4, rtol=1e-4)
    assert jnp.allclose(y2_eval, noisy_linear_ref(x2, params2, False), atol=1e-4, rtol=1e-4)
    # TODO(synk): at this toy size pallas_call launch overhead dominates; fusing
    # several NoisyLinear layers into one call is the only real lever there.

    print("KERNEL_OK")
</pallas_src>

<mosaic_0001>
module attributes {stable_mosaic.version = 11 : i64} {
  func.func @_noisy_linear_train_kernel(%arg0: i32, %arg1: i32, %arg2: memref<16x512xf32, #tpu.memory_space<vmem>>, %arg3: memref<1x512xf32, #tpu.memory_space<vmem>>, %arg4: memref<512x128xbf16, #tpu.memory_space<vmem>>, %arg5: memref<512x128xbf16, #tpu.memory_space<vmem>>, %arg6: memref<1x128xf32, #tpu.memory_space<vmem>>, %arg7: memref<1x128xf32, #tpu.memory_space<vmem>>, %arg8: memref<1x128xf32, #tpu.memory_space<vmem>>, %arg9: memref<1x128xf32, #tpu.memory_space<vmem>>, %arg10: memref<16x128xf32, #tpu.memory_space<vmem>>) attributes {dimension_semantics = [#tpu.dimension_semantics<parallel>, #tpu.dimension_semantics<arbitrary>], iteration_bounds = array<i64: 3, 1>, scalar_prefetch = 0 : i64, scratch_operands = 0 : i64, tpu.core_type = #tpu.core_type<tc>, window_params = [{transform_indices = @transform_0, window_bounds = array<i64: 16, 512>}, {transform_indices = @transform_1, window_bounds = array<i64: 1, 512>}, {transform_indices = @transform_2, window_bounds = array<i64: 512, 128>}, {transform_indices = @transform_3, window_bounds = array<i64: 512, 128>}, {transform_indices = @transform_4, window_bounds = array<i64: 1, 128>}, {transform_indices = @transform_5, window_bounds = array<i64: 1, 128>}, {transform_indices = @transform_6, window_bounds = array<i64: 1, 128>}, {transform_indices = @transform_7, window_bounds = array<i64: 1, 128>}, {transform_indices = @transform_8, window_bounds = array<i64: 16, 128>}]} {
    %c0_i32 = arith.constant 0 : i32
    %0 = arith.cmpi eq, %arg1, %c0_i32 : i32
    %1 = arith.extui %0 : i1 to i32
    %c0_i32_0 = arith.constant 0 : i32
    %2 = arith.cmpi ne, %1, %c0_i32_0 : i32
    scf.if %2 {
      %cst_17 = arith.constant 0.000000e+00 : f32
      %23 = vector.broadcast %cst_17 : f32 to vector<16x128xf32>
      %c0_18 = arith.constant 0 : index
      %c0_19 = arith.constant 0 : index
      %24 = vector.load %arg10[%c0_18, %c0_19] : memref<16x128xf32, #tpu.memory_space<vmem>>, vector<16x128xf32>
      tpu.vector_store %arg10[%c0_18, %c0_19], %23 {strides = array<i32>} : memref<16x128xf32, #tpu.memory_space<vmem>>, vector<16x128xf32>,
    } else {
    }
    %c0 = arith.constant 0 : index
    %c0_1 = arith.constant 0 : index
    %3 = vector.load %arg2[%c0, %c0_1] : memref<16x512xf32, #tpu.memory_space<vmem>>, vector<16x512xf32>
    %4 = arith.truncf %3 : vector<16x512xf32> to vector<16x512xbf16>
    %c0_2 = arith.constant 0 : index
    %c0_3 = arith.constant 0 : index
    %5 = vector.load %arg4[%c0_2, %c0_3] : memref<512x128xbf16, #tpu.memory_space<vmem>>, vector<512x128xbf16>
    %cst = arith.constant dense<0.000000e+00> : vector<16x128xf32>
    %6 = tpu.matmul %4, %5, %cst {dimension_numbers = #tpu.dot_dimension_numbers<[1], [0], [0], [1], [0, 0, 1, 1], [], []>} : vector<16x512xbf16>, vector<512x128xbf16>, vector<16x128xf32> -> vector<16x128xf32>
    %c0_4 = arith.constant 0 : index
    %c0_5 = arith.constant 0 : index
    %7 = vector.load %arg3[%c0_4, %c0_5] : memref<1x512xf32, #tpu.memory_space<vmem>>, vector<1x512xf32>
    %8 = vector.broadcast %7 : vector<1x512xf32> to vector<16x512xf32>
    %9 = arith.mulf %3, %8 : vector<16x512xf32>
    %10 = arith.truncf %9 : vector<16x512xf32> to vector<16x512xbf16>
    %c0_6 = arith.constant 0 : index
    %c0_7 = arith.constant 0 : index
    %11 = vector.load %arg5[%c0_6, %c0_7] : memref<512x128xbf16, #tpu.memory_space<vmem>>, vector<512x128xbf16>
    %cst_8 = arith.constant dense<0.000000e+00> : vector<16x128xf32>
    %12 = tpu.matmul %10, %11, %cst_8 {dimension_numbers = #tpu.dot_dimension_numbers<[1], [0], [0], [1], [0, 0, 1, 1], [], []>} : vector<16x512xbf16>, vector<512x128xbf16>, vector<16x128xf32> -> vector<16x128xf32>
    %c0_9 = arith.constant 0 : index
    %c0_10 = arith.constant 0 : index
    %13 = vector.load %arg10[%c0_9, %c0_10] : memref<16x128xf32, #tpu.memory_space<vmem>>, vector<16x128xf32>
    %c0_11 = arith.constant 0 : index
    %c0_12 = arith.constant 0 : index
    %14 = vector.load %arg6[%c0_11, %c0_12] : memref<1x128xf32, #tpu.memory_space<vmem>>, vector<1x128xf32>
    %15 = vector.broadcast %14 : vector<1x128xf32> to vector<16x128xf32>
    %16 = arith.mulf %12, %15 : vector<16x128xf32>
    %17 = arith.addf %6, %16 : vector<16x128xf32>
    %18 = arith.addf %13, %17 : vector<16x128xf32>
    %c0_13 = arith.constant 0 : index
    %c0_14 = arith.constant 0 : index
    %19 = vector.load %arg10[%c0_13, %c0_14] : memref<16x128xf32, #tpu.memory_space<vmem>>, vector<16x128xf32>
    tpu.vector_store %arg10[%c0_13, %c0_14], %18 {strides = array<i32>} : memref<16x128xf32, #tpu.memory_space<vmem>>, vector<16x128xf32>,
    %c0_i32_15 = arith.constant 0 : i32
    %20 = arith.cmpi eq, %arg1, %c0_i32_15 : i32
    %21 = arith.extui %20 : i1 to i32
    %c0_i32_16 = arith.constant 0 : i32
    %22 = arith.cmpi ne, %21, %c0_i32_16 : i32
    scf.if %22 {
      %c0_17 = arith.constant 0 : index
      %c0_18 = arith.constant 0 : index
      %23 = vector.load %arg10[%c0_17, %c0_18] : memref<16x128xf32, #tpu.memory_space<vmem>>, vector<16x128xf32>
      %c0_19 = arith.constant 0 : index
      %c0_20 = arith.constant 0 : index
      %24 = vector.load %arg7[%c0_19, %c0_20] : memref<1x128xf32, #tpu.memory_space<vmem>>, vector<1x128xf32>
      %c0_21 = arith.constant 0 : index
      %c0_22 = arith.constant 0 : index
      %25 = vector.load %arg8[%c0_21, %c0_22] : memref<1x128xf32, #tpu.memory_space<vmem>>, vector<1x128xf32>
      %c0_23 = arith.constant 0 : index
      %c0_24 = arith.constant 0 : index
      %26 = vector.load %arg9[%c0_23, %c0_24] : memref<1x128xf32, #tpu.memory_space<vmem>>, vector<1x128xf32>
      %27 = arith.mulf %25, %26 : vector<1x128xf32>
      %28 = arith.addf %24, %27 : vector<1x128xf32>
      %29 = vector.broadcast %28 : vector<1x128xf32> to vector<16x128xf32>
      %30 = arith.addf %23, %29 : vector<16x128xf32>
      %c0_25 = arith.constant 0 : index
      %c0_26 = arith.constant 0 : index
      %31 = vector.load %arg10[%c0_25, %c0_26] : memref<16x128xf32, #tpu.memory_space<vmem>>, vector<16x128xf32>
      tpu.vector_store %arg10[%c0_25, %c0_26], %30 {strides = array<i32>} : memref<16x128xf32, #tpu.memory_space<vmem>>, vector<16x128xf32>,
    } else {
    }
    return
  }
  func.func @transform_0(%arg0: i32, %arg1: i32) -> (i32, i32) {
    %c0_i32 = arith.constant 0 : i32
    %c0_i32_0 = arith.constant 0 : i32
    return %c0_i32, %arg1 : i32, i32
  }
  func.func @transform_1(%arg0: i32, %arg1: i32) -> (i32, i32) {
    %c0_i32 = arith.constant 0 : i32
    %c0_i32_0 = arith.constant 0 : i32
    return %c0_i32, %arg1 : i32, i32
  }
  func.func @transform_2(%arg0: i32, %arg1: i32) -> (i32, i32) {
    %c0_i32 = arith.constant 0 : i32
    return %arg1, %arg0 : i32, i32
  }
  func.func @transform_3(%arg0: i32, %arg1: i32) -> (i32, i32) {
    %c0_i32 = arith.constant 0 : i32
    return %arg1, %arg0 : i32, i32
  }
  func.func @transform_4(%arg0: i32, %arg1: i32) -> (i32, i32) {
    %c0_i32 = arith.constant 0 : i32
    %c0_i32_0 = arith.constant 0 : i32
    return %c0_i32, %arg0 : i32, i32
  }
  func.func @transform_5(%arg0: i32, %arg1: i32) -> (i32, i32) {
    %c0_i32 = arith.constant 0 : i32
    %c0_i32_0 = arith.constant 0 : i32
    return %c0_i32, %arg0 : i32, i32
  }
  func.func @transform_6(%arg0: i32, %arg1: i32) -> (i32, i32) {
    %c0_i32 = arith.constant 0 : i32
    %c0_i32_0 = arith.constant 0 : i32
    return %c0_i32, %arg0 : i32, i32
  }
  func.func @transform_7(%arg0: i32, %arg1: i32) -> (i32, i32) {
    %c0_i32 = arith.constant 0 : i32
    %c0_i32_0 = arith.constant 0 : i32
    return %c0_i32, %arg0 : i32, i32
  }
  func.func @transform_8(%arg0: i32, %arg1: i32) -> (i32, i32) {
    %c0_i32 = arith.constant 0 : i32
    %c0_i32_0 = arith.constant 0 : i32
    return %c0_i32, %arg0 : i32, i32
  }
}

</mosaic_0001>

<bundles_post_ra>
// kernel: tpu_custom_call.1
= control target key start
LH: loop header
LB: loop body
LE: loop exit
PB: predicated region body
PF: predicated region fallthrough
CT: control target
= control target key end

     0   :  { %s2434_s0 = inlined_call_operand.hbm [shape: f32[16,512], index: 0, kind: input, shape index: {}]   ;;  %s2435_s1 = inlined_call_operand.hbm [shape: f32[1,512], index: 1, kind: input, shape index: {}]   ;;  %s2436_s2 = inlined_call_operand.hbm [shape: bf16[512,384], index: 2, kind: input, shape index: {}]   ;;  %s2437_s3 = inlined_call_operand.hbm [shape: bf16[512,384], index: 3, kind: input, shape index: {}]   ;;  %s2438_s4 = inlined_call_operand.vmem [shape: f32[1,384], index: 4, kind: input, shape index: {}]   ;;  %s2439_s5 = inlined_call_operand.vmem [shape: f32[1,384], index: 5, kind: input, shape index: {}]   ;;  %s2440_s6 = inlined_call_operand.vmem [shape: f32[1,384], index: 6, kind: input, shape index: {}]   ;;  %s2441_s7 = inlined_call_operand.vmem [shape: f32[1,384], index: 7, kind: input, shape index: {}]   ;;  %s2442_s8 = inlined_call_operand.hbm [shape: f32[16,384], index: 8, kind: output, shape index: {}]  }
   0x1   :  { %2457 = sst [smem:[#allocation19_spill]] %s2434_s0 }
   0x2   :  { %2458 = sst [smem:[#allocation20_spill]] %s2436_s2 }
   0x3   :  { %2459 = sst [smem:[#allocation21_spill]] %s2438_s4 }
   0x4   :  { %2460 = sst [smem:[#allocation22_spill]] %s2439_s5 }
   0x5   :  { %2461 = sst [smem:[#allocation23_spill]] %s2441_s7 }
   0x6   :  { %2462 = sst [smem:[#allocation24_spill]] %s2442_s8 }
   0x7   :  { %13 = vsyncpa [#allocation3], 0 }
   0x8   :  { %14 = vsyncpa [#allocation6], 0 }
   0x9   :  { %15 = vsyncpa [#allocation4], 0 }
   0xa   :  { %17 = vsyncpa [#allocation4 + $0x1], 0  ;;  %s2023_s27 = smov 0   ;;  %s2025_s28 = smov 0  }
   0xb   :  { %s2027_s29 = smov 0   ;;  %s2029_s30 = smov 0  }
   0xc   :  { %s2031_s9 = smov 0   ;;  %s2033_s10 = smov 0  }
   0xd LB: > { %2463 = sst [smem:[#allocation14_spill]] %s1943_s27  ;;  %s2054_s11 = sadd.s32 4294967295, %s1963_s10   ;;  %s1963_s10 = sphi %s2033_s10, %s23_s10   ;;  %s1959_s9 = sphi %s2031_s9, %s2505_s9   ;;  %s1955_s30 = sphi %s2029_s30, %s2504_s30   ;;  %s1951_s29 = sphi %s2027_s29, %s2503_s29   ;;  %s1947_s28 = sphi %s2025_s28, %s2502_s28   ;;  %s1943_s27 = sphi %s2023_s27, %s2501_s27  }
   0xe   : > { %s1424_s12 = sadd.s32 4294967294, %s1963_s10   ;;  %p103_p0 = scmp.ne.s32.totalorder %s1951_s29, %s1947_s28 }
   0xf   : > { %p104_p1 = scmp.eq.s32.totalorder %s1963_s10, 0  ;;  %p109_p2 = scmp.ne.s32.totalorder %s1947_s28, %s1943_s27 }
  0x10   : > { %p2444_p3 = scmp.eq.s32.totalorder %s2054_s11, 0  ;;  %p265_p4 = scmp.eq.s32.totalorder %s2054_s11, 2 }
  0x11   : > { %p2065_p5 = por %p104_p1, %p103_p0  ;;  %p271_p6 = scmp.eq.s32.totalorder %s1424_s12, 2 }
  0x12   : > { %p2071_p7 = por %p2444_p3, %p109_p2  ;;  %p2075_p8 = por %p265_p4, %p103_p0 }
  0x13   : > { %p2079_p9 = por %p271_p6, %p109_p2  ;;  %p1425_p10 = scmp.ge.s32.totalorder %s1963_s10, 1 }
  0x14   : > { %s2465_s15 = scalar_select %p2071_p7, 1, 0 }
  0x15   : > { %s2466_s16 = scalar_select %p2075_p8, 1, 0 }
  0x16   : > { %s2468_s17 = scalar_select %p2079_p9, 1, 0 }
  0x17   : > { %2467 = sst [smem:[#allocation15_spill]] %s2466_s16  ;;  %p278_p11 = scmp.lt.s32.totalorder %s1963_s10, 4 }
  0x18   : > { %2469 = sst [smem:[#allocation16_spill]] %s2468_s17  ;;  %s1965_s19 = smov [#allocation2]  }
  0x19   : > { %p2085_p12 = pnand %p1425_p10, %p278_p11  ;;  %s293_s20 = sshll.u32 %s1965_s19, 4  ;;  %s2089_s20 = int_to_ptr.vmem [resolvable:$true] %s293_s20 }
  0x1a   : > { %p1630_p0 = scmp.lt.s32.totalorder %s1963_s10, 3  ;;  %s35_s23 = sadd.s32 1, %s1959_s9 }
  0x1b   : > { %s2470_s18 = scalar_select %p2085_p12, 1, 0 }
  0x1c   : > { %p1610_p13 = pneg %p2085_p12  ;;  %p2102_p2 = pnand %p1630_p0, %p2065_p5 }
  0x1d   : > { %p2107_p4 = scmp.ge.s32.totalorder %s35_s23, 3  ;;  %s2474_s0 = sld [smem:[#allocation19_spill]] }
  0x1e   : > { %p2096_p1 = pnand %p1610_p13, %p2444_p3 }
  0x1f   : > { %s2472_s22 = scalar_select %p2102_p2, 1, 0 }
  0x20   : > { %p2452_p10 = pneg %p2096_p1 }
  0x23   : > { %s1757_s12 = scalar_lea.hbm %s2474_s0, 1024 }
  0x24   : > { %p1758_p6 = scmp.ne.s32.totalorder %s2474_s0, %s1757_s12  ;;  %p1764_p13 = scmp.lt.u32.totalorder %s1757_s12, %s2474_s0 }
  0x26   : > { %p1760_p5 = pnand %p2452_p10, %p1758_p6 }
  0x28   : > { %p1761_p11 = pneg %p1760_p5 }
  0x2a   : > { %p1766_p0 = pnand %p1764_p13, %p1761_p11 }
  0x2c   : > { %1769 = shalt.err (!%p1766_p0)
}
  0x2d   : > { %s1770_s25 = scalar_lea.vmem %s2089_s20, 1024  ;;  %p1778_p7 = scmp.lt.s32.totalorder %s2089_s20, %s2089_s20 }
  0x2e   : > { %p1771_p3 = scmp.ne.s32.totalorder %s2089_s20, %s1770_s25  ;;  %p1779_p6 = scmp.lt.s32.totalorder %s1770_s25, %s1770_s25 }
  0x30   : > { %p1773_p9 = pnand %p1771_p3, %p2452_p10  ;;  %p1780_p5 = por %p1779_p6, %p1778_p7 }
  0x32   : > { %p1774_p8 = pneg %p1773_p9 }
  0x34   : > { %p1781_p12 = pnand %p1780_p5, %p1774_p8 }
  0x36   : > { %1784 = shalt.err (!%p1781_p12)
}
  0x37   : > { %s1966_s13 = smov 512   ;;  %s1967_s17 = smov 32  }
  0x38   : > { %1613 = dma.hbm_to_vmem [thread:$0]  (!%p2096_p1), %s2474_s0, 1024, %s2089_s20, [#allocation3], %s1966_s13, %s1966_s13, %s1967_s17  }
  0x39   : > { %s321_s19 = sand.u32 1, %s1963_s10   ;;  %s2507_s23 = smov (%p2107_p4, %s35_s23), 0 }
  0x3a   : > { %2475 = sst [smem:[#allocation17_spill]] %s2507_s23  ;;  %s323_s14 = sand.u32 1, %s1951_s29  }
  0x3b   : > { %s92_s25 = ssub.s32 %s1959_s9, %s2507_s23  ;;  %s2146_s27 = sshll.u32 %s323_s14, 8 }
  0x3c   : > { %p94_p3 = scmp.eq.s32.totalorder %s92_s25, 0  ;;  %s1430_s8 = sshll.u32 %s1959_s9, 6 }
  0x3d   : > { %s325_s16 = scalar_lea.vmem [#allocation7], %s2146_s27  ;;  %s2476_s5 = sadd.s32 1, %s1951_s29 }
  0x3e   : > { %s334_s4 = sshll.u32 %s325_s16, 4  ;;  %s2478_s2 = sld [smem:[#allocation20_spill]]  ;;  %s2162_s4 = int_to_ptr.vmem [resolvable:$true] %s334_s4 }
  0x3f   : > { %s2153_s7 = scalar_select %p94_p3, %s1951_s29, %s2476_s5  }
  0x40   : > { %s2164_s17 = scalar_lea.sflag [#allocation3], %s321_s19  ;;  %p2454_p8 = pneg %p2102_p2 }
  0x41   : > { %2477 = sst [smem:[#allocation18_spill]] %s2153_s7 }
  0x44   : > { %s2160_s24 = scalar_lea.hbm %s2478_s2, %s1430_s8  ;;  %s1790_s12 = scalar_lea.hbm %s2478_s2, 12288 }
  0x45   : > { %s1785_s26 = scalar_lea.hbm %s2160_s24, 4096  ;;  %p1791_p4 = scmp.lt.u32.totalorder %s2160_s24, %s2478_s2 }
  0x46   : > { %p1786_p7 = scmp.ne.s32.totalorder %s2160_s24, %s1785_s26  ;;  %p1792_p11 = scmp.lt.u32.totalorder %s1790_s12, %s1785_s26 }
  0x47   : > { %p1794_p0 = scmp.lt.u32.totalorder %s1785_s26, %s2160_s24 }
  0x48   : > { %p1788_p9 = pnand %p2454_p8, %p1786_p7  ;;  %p1793_p13 = por %p1792_p11, %p1791_p4 }
  0x4a   : > { %p1789_p12 = pneg %p1788_p9  ;;  %p1795_p6 = por %p1794_p0, %p1793_p13 }
  0x4c   : > { %p1796_p5 = pnand %p1795_p6, %p1789_p12 }
  0x4e   : > { %1799 = shalt.err (!%p1796_p5)
}
  0x4f   : > { %s1800_s19 = scalar_lea.vmem %s2162_s4, 4096  ;;  %s1968_s20 = smov [#allocation7]  }
  0x50   : > { %p1801_p3 = scmp.ne.s32.totalorder %s2162_s4, %s1800_s19  ;;  %s1805_s13 = sshll.u32 %s1968_s20, 4  ;;  %s1806_s13 = int_to_ptr.vmem [resolvable:$false] %s1805_s13 }
  0x51   : > { %s1807_s5 = scalar_lea.vmem %s1806_s13, 8192  ;;  %p1808_p10 = scmp.lt.s32.totalorder %s2162_s4, %s1806_s13 }
  0x52   : > { %p1803_p7 = pnand %p1801_p3, %p2454_p8  ;;  %p1809_p4 = scmp.lt.s32.totalorder %s1807_s5, %s1800_s19 }
  0x54   : > { %p1804_p9 = pneg %p1803_p7  ;;  %p1810_p11 = por %p1809_p4, %p1808_p10 }
  0x56   : > { %p1811_p13 = pnand %p1810_p11, %p1804_p9 }
  0x58   : > { %1814 = shalt.err (!%p1811_p13)
}
  0x59   : > { %s1969_s26 = smov 192   ;;  %s1970_s16 = smov 64  }
  0x5a   : > { %s1971_s12 = smov 4   ;;  %s1972_s14 = smov [#allocation5]  }
  0x5b   : > { %1620 = dma.hbm_to_vmem [thread:$0]  (!%p2102_p2), %s2160_s24, 4096, %s2162_s4, %s2164_s17, %s1969_s26, %s1970_s16, %s1971_s12  }
  0x5c   : > { %s310_s25 = sshll.u32 %s1972_s14, 4  ;;  %s2200_s13 = scalar_lea.hbm %s2437_s3, %s1430_s8  ;;  %s311_s25 = int_to_ptr.vmem [resolvable:$true] %s310_s25 }
  0x5d   : > { %s1815_s2 = scalar_lea.hbm %s2435_s1, 64  ;;  %p2479_p12 = pneg %p2096_p1 }
  0x5e   : > { %p1816_p10 = scmp.ne.s32.totalorder %s2435_s1, %s1815_s2  ;;  %p1822_p5 = scmp.lt.u32.totalorder %s1815_s2, %s2435_s1 }
  0x60   : > { %p1818_p0 = pnand %p1816_p10, %p2479_p12 }
  0x62   : > { %p1819_p6 = pneg %p1818_p0 }
  0x64   : > { %p1824_p3 = pnand %p1822_p5, %p1819_p6 }
  0x66   : > { %1827 = shalt.err (!%p1824_p3)
}
  0x67   : > { %s1828_s8 = scalar_lea.vmem %s311_s25, 64  ;;  %p2480_p9 = pmov %p2479_p12 }
  0x68   : > { %p1829_p7 = scmp.ne.s32.totalorder %s311_s25, %s1828_s8  ;;  %p1836_p13 = scmp.lt.s32.totalorder %s311_s25, %s311_s25 }
  0x69   : > { %p1837_p8 = scmp.lt.s32.totalorder %s1828_s8, %s1828_s8 }
  0x6a   : > { %p1831_p4 = pnand %p1829_p7, %p2480_p9 }
  0x6b   : > { %p1838_p2 = por %p1837_p8, %p1836_p13 }
  0x6c   : > { %p1832_p11 = pneg %p1831_p4 }
  0x6e   : > { %p1839_p10 = pnand %p1838_p2, %p1832_p11 }
  0x70   : > { %1842 = shalt.err (!%p1839_p10)
}
  0x71   : > { %1616 = dma.hbm_to_vmem [thread:$0]  (!%p2096_p1), %s2435_s1, 64, %s311_s25, [#allocation6]  }
  0x72   : > { %s348_s2 = scalar_lea.vmem [#allocation8], %s2146_s27  ;;  %s1843_s14 = scalar_lea.hbm %s2200_s13, 4096 }
  0x73   : > { %s357_s23 = sshll.u32 %s348_s2, 4  ;;  %p1844_p8 = scmp.ne.s32.totalorder %s2200_s13, %s1843_s14  ;;  %s2223_s23 = int_to_ptr.vmem [resolvable:$true] %s357_s23 }
  0x74   : > { %p2481_p2 = scmp.ne.s32.totalorder %s2472_s22, 0  ;;  %s1848_s20 = scalar_lea.hbm %s2437_s3, 12288 }
  0x75   : > { %p1849_p5 = scmp.lt.u32.totalorder %s2200_s13, %s2437_s3  ;;  %p1850_p3 = scmp.lt.u32.totalorder %s1848_s20, %s1843_s14 }
  0x76   : > { %p2482_p12 = pneg %p2481_p2  ;;  %p1852_p7 = scmp.lt.u32.totalorder %s1843_s14, %s2200_s13 }
  0x77   : > { %p1851_p1 = por %p1850_p3, %p1849_p5 }
  0x78   : > { %p1846_p0 = pnand %p1844_p8, %p2482_p12 }
  0x79   : > { %p1853_p9 = por %p1852_p7, %p1851_p1 }
  0x7a   : > { %p1847_p6 = pneg %p1846_p0 }
  0x7c   : > { %p1854_p4 = pnand %p1853_p9, %p1847_p6 }
  0x7e   : > { %1857 = shalt.err (!%p1854_p4)
}
  0x7f   : > { %s1858_s27 = scalar_lea.vmem %s2223_s23, 4096  ;;  %p2483_p13 = pmov %p2482_p12 }
  0x80   : > { %p1859_p11 = scmp.ne.s32.totalorder %s2223_s23, %s1858_s27  ;;  %s1973_s25 = smov [#allocation8]  }
  0x81   : > { %s1863_s24 = sshll.u32 %s1973_s25, 4  ;;  %s1864_s24 = int_to_ptr.vmem [resolvable:$false] %s1863_s24 }
  0x82   : > { %p1861_p10 = pnand %p1859_p11, %p2483_p13  ;;  %s1865_s8 = scalar_lea.vmem %s1864_s24, 8192 }
  0x83   : > { %p1866_p12 = scmp.lt.s32.totalorder %s2223_s23, %s1864_s24  ;;  %p1867_p0 = scmp.lt.s32.totalorder %s1865_s8, %s1858_s27 }
  0x84   : > { %p1862_p8 = pneg %p1861_p10 }
  0x85   : > { %p1868_p5 = por %p1867_p0, %p1866_p12 }
  0x87   : > { %p1869_p3 = pnand %p1868_p5, %p1862_p8 }
  0x89   : > { %1872 = shalt.err (!%p1869_p3)
}
  0x8a   : > { %1623 = dma.hbm_to_vmem [thread:$0]  (!%p2481_p2), %s2200_s13, 4096, %s2223_s23, %s2164_s17, %s1969_s26, %s1970_s16, %s1971_s12  }
  0x8b   : > { %p2484_p6 = scmp.ne.s32.totalorder %s2470_s18, 0 }
  0x8c   : > { %p2485_p1 = scmp.eq.s32.totalorder (!%p2484_p6), %s2054_s11, 0 }
  0x8d   : > { %393 = sbr.rel (%p2484_p6) target bundleno = 463 (0x1cf), region = 52 }
  0x94   : > { %1926 = dma.done.wait (%p2485_p1), [#allocation3], 1024   ;;  %p2486_p7 = pmov %p2485_p1 }
  0x95   : > { %p2487_p9 = pmov %p2485_p1 }
  0x96   : > { %1928 = vsyncadd (%p2486_p7), [#allocation3], 4294966272 }
  0x97   : > { %1930 = dma.done.wait (%p2487_p9), [#allocation6], 64   ;;  %p2488_p4 = pmov %p2485_p1 }
  0x98   : > { %s403_s22 = sand.u32 1, %s2054_s11   ;;  %s2264_s17 = sand.u32 1, %s1947_s28  }
  0x99   : > { %1932 = vsyncadd (%p2488_p4), [#allocation6], 4294967232  ;;  %s1436_s18 = sshll.u32 %s2264_s17, 8  ;;  %s404_s26 = scalar_lea.sflag [#allocation3], %s403_s22 }
  0x9a   : > { %s2267_s16 = scalar_lea.vmem [#allocation7], %s1436_s18  ;;  %p2489_p2 = scmp.ne.s32.totalorder %s2465_s15, 0 }
  0x9c   : > { %1934 = dma.done.wait (%p2489_p2), %s404_s26, 8192  }
  0x9d   : > { %1936 = vsyncadd (%p2489_p2), %s404_s26, 4294959104  ;;  %s2273_s12 = scalar_lea.vmem [#allocation8], %s1436_s18  ;;  %v567_v19 = vlaneseq  ;;  %v490_v38 = vld [vmem:[#allocation2 + $0x8] sm:$0xff]  ;;  %v565_v40 = vld [vmem:[#allocation5] sm:$0xf]  ;;  %p470_p11 = scmp.lt.s32.totalorder %s1955_s30, 2 }
  0x9e   : > { %v1693_v0 = vld [vmem:[%s2273_s12 + $0x40] sm:$0xff]   ;;  %v1697_v4 = vld [vmem:[%s2273_s12 + $0x48] sm:$0xff]   ;;  %v1701_v8 = vld [vmem:[%s2273_s12 + $0x50] sm:$0xff]   ;;  %s2490_s23 = sld [smem:[#allocation23_spill]]  ;;  %s2491_s20 = sld [smem:[#allocation22_spill]] }
  0x9f   : > { %v1694_v1 = vld [vmem:[%s2273_s12 + $0xc0] sm:$0xff]   ;;  %1508 = vmatprep.subr.bf16.mxu0 %v1693_v0  ;;  %v1698_v5 = vld [vmem:[%s2273_s12 + $0xc8] sm:$0xff]   ;;  %v1702_v9 = vld [vmem:[%s2273_s12 + $0xd0] sm:$0xff]   ;;  %v2298_v24 = vshrl.u32 %v567_v19, 7  ;;  %s471_s11 = scalar_select %p470_p11, %s1955_s30, 2 }
  0xa0   : > { %v1695_v2 = vld [vmem:[%s2273_s12] sm:$0xff]   ;;  %1530 = vmatprep.subr.bf16.mxu1 %v1694_v1  ;;  %v1699_v6 = vld [vmem:[%s2273_s12 + $0x8] sm:$0xff]   ;;  %v1703_v10 = vld [vmem:[%s2273_s12 + $0x10] sm:$0xff]   ;;  %s2492_s25 = sld [smem:[#allocation21_spill]]  ;;  %s1438_s8 = sshll.u32 %s2264_s17, 4 }
  0xa1   : > { %v1696_v3 = vld [vmem:[%s2273_s12 + $0x80] sm:$0xff]   ;;  %1509 = vmatpush3.bf16.msra.mxu0 %v1695_v2  ;;  %v1700_v7 = vld [vmem:[%s2273_s12 + $0x88] sm:$0xff]   ;;  %v1704_v11 = vld [vmem:[%s2273_s12 + $0x90] sm:$0xff]   ;;  %v573_v29 = vsub.s32 1, %v2298_v24  ;;  %v581_v31 = vsub.s32 3, %v2298_v24  ;;  %v569_v33 = vsub.s32 0, %v2298_v24  ;;  %s478_s0 = scalar_lea.vmem %s2440_s6, %s471_s11 }
  0xa2   : > { %1531 = vmatpush3.bf16.msra.mxu1 %v1696_v3  ;;  %1510 = vmatprep.subr.bf16.mxu0 %v1697_v4  ;;  %v1705_v12 = vld [vmem:[%s2273_s12 + $0x58] sm:$0xff]   ;;  %v1709_v16 = vld [vmem:[%s2273_s12 + $0x60] sm:$0xff]   ;;  %v1713_v21 = vld [vmem:[%s2273_s12 + $0x68] sm:$0xff]   ;;  %v577_v35 = vsub.s32 2, %v2298_v24  ;;  %s2493_s22 = sld [smem:[#allocation15_spill]]  ;;  %s1505_s18 = sshll.u32 %s1955_s30, 7 }
  0xa3   : > { %1532 = vmatprep.subr.bf16.mxu1 %v1698_v5  ;;  %v1706_v13 = vld [vmem:[%s2273_s12 + $0xd8] sm:$0xff]   ;;  %v1710_v17 = vld [vmem:[%s2273_s12 + $0xe0] sm:$0xff]   ;;  %v1714_v22 = vld [vmem:[%s2273_s12 + $0xe8] sm:$0xff]   ;;  %v574_v41 = vrot.slane %v565_v40, %v573_v29  ;;  %v582_v44 = vrot.slane %v565_v40, %v581_v31  ;;  %v570_v46 = vrot.slane %v565_v40, %v569_v33  ;;  %s465_s26 = scalar_lea.vmem [#allocation9], %s1438_s8  ;;  %s2494_s15 = sld [smem:[#allocation24_spill]] }
  0xa4   : > { %v1707_v14 = vld [vmem:[%s2273_s12 + $0x18] sm:$0xff]   ;;  %v1711_v18 = vld [vmem:[%s2273_s12 + $0x20] sm:$0xff]   ;;  %v1715_v23 = vld [vmem:[%s2273_s12 + $0x28] sm:$0xff]   ;;  %v578_v47 = vrot.slane %v565_v40, %v577_v35  ;;  %s481_s14 = scalar_lea.vmem %s2490_s23, %s471_s11  ;;  %s475_s5 = scalar_lea.vmem %s2491_s20, %s471_s11 }
  0xa5   : > { %1511 = vmatpush3.bf16.msra.mxu0 %v1699_v6  ;;  %v1708_v15 = vld [vmem:[%s2273_s12 + $0x98] sm:$0xff]   ;;  %v1712_v20 = vld [vmem:[%s2273_s12 + $0xa0] sm:$0xff]   ;;  %v1716_v25 = vld [vmem:[%s2273_s12 + $0xa8] sm:$0xff]   ;;  %v588_v49 = vmul.f32 %v574_v41, %v490_v38  ;;  %s1974_s30 = smov [#allocation9]  }
  0xa6   : > { %1533 = vmatpush3.bf16.msra.mxu1 %v1700_v7  ;;  %1512 = vmatprep.subr.bf16.mxu0 %v1701_v8  ;;  %v1717_v26 = vld [vmem:[%s2273_s12 + $0x70] sm:$0xff]   ;;  %v1721_v32 = vld [vmem:[%s2273_s12 + $0x78] sm:$0xff]   ;;  %v494_v39 = vld [vmem:[#allocation2 + $0x28] sm:$0xff]  ;;  %s472_s24 = scalar_lea.vmem %s2492_s25, %s471_s11  ;;  %s1877_s2 = sshll.u32 %s1974_s30, 4  ;;  %s1878_s2 = int_to_ptr.vmem [resolvable:$false] %s1877_s2 }
  0xa7   : > { %1534 = vmatprep.subr.bf16.mxu1 %v1702_v9  ;;  %v1718_v27 = vld [vmem:[%s2273_s12 + $0xf0] sm:$0xff]   ;;  %v1722_v34 = vld [vmem:[%s2273_s12 + $0xf8] sm:$0xff]   ;;  %v592_v50 = vmul.f32 %v574_v41, %v494_v39  ;;  %v1725_v58 = vld [vmem:[%s2267_s16 + $0x40] sm:$0xff]   ;;  %v498_v3 = vpack.c.bf16 %v494_v39, %v490_v38  ;;  %s1879_s23 = scalar_lea.vmem %s1878_s2, 512 }
  0xa8   : > { %v1719_v28 = vld [vmem:[%s2273_s12 + $0x30] sm:$0xff]   ;;  %v1723_v36 = vld [vmem:[%s2273_s12 + $0x38] sm:$0xff]   ;;  %v1726_v62 = vld [vmem:[%s2267_s16 + $0xc0] sm:$0xff]   ;;  %p2495_p10 = scmp.ne.s32.totalorder %s2493_s22, 0 }
  0xa9   : > { %1513 = vmatpush3.bf16.msra.mxu0 %v1703_v10  ;;  %v1720_v30 = vld [vmem:[%s2273_s12 + $0xb0] sm:$0xff]   ;;  %v1724_v37 = vld [vmem:[%s2273_s12 + $0xb8] sm:$0xff]   ;;  %v596_v59 = vpack.c.bf16 %v592_v50, %v588_v49  ;;  %v1727_v0 = vld [vmem:[%s2267_s16] sm:$0xff]   ;;  %s2384_s13 = scalar_lea.hbm %s2494_s15, %s1505_s18 }
  0xaa   : > { %1535 = vmatpush3.bf16.msra.mxu1 %v1704_v11  ;;  %1514 = vmatprep.subr.bf16.mxu0 %v1705_v12  ;;  %v492_v42 = vld [vmem:[#allocation2 + $0x18] sm:$0xff]  ;;  %v2313_v45 = vld [vmem:[#allocation2] sm:$0xff]  ;;  %v2319_v53 = vld [vmem:[#allocation2 + $0x10] sm:$0xff] }
  0xab   : > { %1536 = vmatprep.subr.bf16.mxu1 %v1706_v13  ;;  %v496_v43 = vld [vmem:[#allocation2 + $0x38] sm:$0xff]  ;;  %v2317_v48 = vld [vmem:[#allocation2 + $0x20] sm:$0xff]  ;;  %v590_v51 = vmul.f32 %v582_v44, %v492_v42  ;;  %v2321_v54 = vld [vmem:[#allocation2 + $0x30] sm:$0xff]  ;;  %v587_v55 = vmul.f32 %v570_v46, %v2313_v45  ;;  %v589_v57 = vmul.f32 %v578_v47, %v2319_v53  ;;  %887 = vmatprep.mubr.bf16.mxu0 %v596_v59 }
  0xac   : > { %v594_v52 = vmul.f32 %v582_v44, %v496_v43  ;;  %v591_v56 = vmul.f32 %v570_v46, %v2317_v48  ;;  %v593_v61 = vmul.f32 %v578_v47, %v2321_v54  ;;  %v1728_v2 = vld [vmem:[%s2267_s16 + $0x80] sm:$0xff]   ;;  %v1729_v4 = vld [vmem:[%s2267_s16 + $0x48] sm:$0xff]   ;;  %v500_v5 = vpack.c.bf16 %v496_v43, %v492_v42  ;;  %v1733_v9 = vld [vmem:[%s2267_s16 + $0x50] sm:$0xff]  }
  0xad   : > { %1515 = vmatpush3.bf16.msra.mxu0 %v1707_v14  ;;  %v1730_v6 = vld [vmem:[%s2267_s16 + $0xc8] sm:$0xff]   ;;  %v1734_v10 = vld [vmem:[%s2267_s16 + $0xd0] sm:$0xff]   ;;  %v1737_v13 = vld [vmem:[%s2267_s16 + $0x58] sm:$0xff]   ;;  %v497_v35 = vpack.c.bf16 %v2317_v48, %v2313_v45 }
  0xae   : > { %1537 = vmatpush3.bf16.msra.mxu1 %v1708_v15  ;;  %1516 = vmatprep.subr.bf16.mxu0 %v1709_v16  ;;  %v598_v60 = vpack.c.bf16 %v594_v52, %v590_v51  ;;  %v595_v63 = vpack.c.bf16 %v591_v56, %v587_v55  ;;  %v597_v1 = vpack.c.bf16 %v593_v61, %v589_v57  ;;  %v1731_v7 = vld [vmem:[%s2267_s16 + $0x8] sm:$0xff]   ;;  %v1735_v11 = vld [vmem:[%s2267_s16 + $0x10] sm:$0xff]   ;;  %v1738_v14 = vld [vmem:[%s2267_s16 + $0xd8] sm:$0xff]  }
  0xaf   : > { %1538 = vmatprep.subr.bf16.mxu1 %v1710_v17  ;;  %v1732_v8 = vld [vmem:[%s2267_s16 + $0x88] sm:$0xff]   ;;  %v1736_v12 = vld [vmem:[%s2267_s16 + $0x90] sm:$0xff]   ;;  %v1739_v15 = vld [vmem:[%s2267_s16 + $0x18] sm:$0xff]  }
  0xb0   : > { %928 = vmatprep.mubr.bf16.mxu1 %v598_v60  ;;  %v1740_v16 = vld [vmem:[%s2267_s16 + $0x98] sm:$0xff]   ;;  %v1741_v17 = vld [vmem:[%s2267_s16 + $0x60] sm:$0xff]   ;;  %v1752_v29 = vld [vmem:[%s2267_s16 + $0xb0] sm:$0xff]  }
  0xb1   : > { %1517 = vmatpush3.bf16.msra.mxu0 %v1711_v18  ;;  %v1742_v18 = vld [vmem:[%s2267_s16 + $0xe0] sm:$0xff]   ;;  %v1754_v31 = vld [vmem:[%s2267_s16 + $0xf8] sm:$0xff]  }
  0xb2   : > { %1539 = vmatpush3.bf16.msra.mxu1 %v1712_v20  ;;  %1518 = vmatprep.subr.bf16.mxu0 %v1713_v21  ;;  %v1743_v19 = vld [vmem:[%s2267_s16 + $0x20] sm:$0xff]   ;;  %v1745_v21 = vld [vmem:[%s2267_s16 + $0x68] sm:$0xff]   ;;  %v1232_v51 = vld [vmem:[%s478_s0] sm:$0x1]  ;;  %s1247_s0 = scalar_lea.sflag [#allocation4], %s2264_s17 }
  0xb3   : > { %1540 = vmatprep.subr.bf16.mxu1 %v1714_v22  ;;  %v1744_v20 = vld [vmem:[%s2267_s16 + $0xa0] sm:$0xff]   ;;  %v1746_v22 = vld [vmem:[%s2267_s16 + $0xe8] sm:$0xff]   ;;  %v1233_v52 = vld [vmem:[%s481_s14] sm:$0x1] }
  0xb4   : > { %v1471_v55 = vld [vmem:[%s472_s24] ss:$0 sm:$0xff] }
  0xb5   : > { %1519 = vmatpush3.bf16.msra.mxu0 %v1715_v23  ;;  %v1747_v23 = vld [vmem:[%s2267_s16 + $0x28] sm:$0xff]  }
  0xb6   : > { %1541 = vmatpush3.bf16.msra.mxu1 %v1716_v25  ;;  %1520 = vmatprep.subr.bf16.mxu0 %v1717_v26  ;;  %v1748_v25 = vld [vmem:[%s2267_s16 + $0xa8] sm:$0xff]   ;;  %v1749_v26 = vld [vmem:[%s2267_s16 + $0x70] sm:$0xff]  }
  0xb7   : > { %1542 = vmatprep.subr.bf16.mxu1 %v1718_v27  ;;  %v1750_v27 = vld [vmem:[%s2267_s16 + $0xf0] sm:$0xff]  }
  0xb9   : > { %1521 = vmatpush3.bf16.msra.mxu0 %v1719_v28  ;;  %v1751_v28 = vld [vmem:[%s2267_s16 + $0x30] sm:$0xff]  }
  0xba   : > { %1543 = vmatpush3.bf16.msra.mxu1 %v1720_v30  ;;  %1522 = vmatprep.subr.bf16.mxu0 %v1721_v32  ;;  %v1753_v30 = vld [vmem:[%s2267_s16 + $0x78] sm:$0xff]  }
  0xbb   : > { %1544 = vmatprep.subr.bf16.mxu1 %v1722_v34  ;;  %v1755_v32 = vld [vmem:[%s2267_s16 + $0x38] sm:$0xff]  }
  0xbc   : > { %v1756_v34 = vld [vmem:[%s2267_s16 + $0xb8] sm:$0xff]   ;;  %s1259_s16 = sshll.u32 %s465_s26, 4  ;;  %s2386_s16 = int_to_ptr.vmem [resolvable:$true] %s1259_s16 }
  0xbd   : > { %1523 = vmatpush3.bf16.msra.mxu0 %v1723_v36  ;;  %v499_v36 = vpack.c.bf16 %v2321_v54, %v2319_v53  ;;  %v1234_v53 = vmul.f32 %v1233_v52, %v1232_v51  ;;  %v1231_v54 = vld [vmem:[%s475_s5] sm:$0x1]  ;;  %s1873_s7 = scalar_lea.vmem %s2386_s16, 256  ;;  %p1880_p0 = scmp.lt.s32.totalorder %s2386_s16, %s1878_s2 }
  0xbe   : > { %1545 = vmatpush3.bf16.msra.mxu1 %v1724_v37  ;;  %1552 = vmatprep.subr.bf16.mxu0 %v1725_v58  ;;  %p1874_p13 = scmp.ne.s32.totalorder %s2386_s16, %s1873_s7  ;;  %p1881_p5 = scmp.lt.s32.totalorder %s1879_s23, %s1873_s7 }
  0xbf   : > { %1574 = vmatprep.subr.bf16.mxu1 %v1726_v62  ;;  %v1235_v59 = vadd.f32 %v1234_v53, %v1231_v54 }
  0xc0   : > { %888 = vmatmul.mubr.bf16.vlgmr.msra.gmra.mrb[0].mxu0 %v595_v63  ;;  %p1875_p8 = pnand %p1874_p13, %p2495_p10  ;;  %p1882_p3 = por %p1881_p5, %p1880_p0 }
  0xc1   : > { %929 = vmatmul.mubr.bf16.vlgmr.msra.gmra.mrb[0].mxu1 %v597_v1  ;;  %1553 = vmatpush3.bf16.msra.mxu0 %v1727_v0 }
  0xc2   : > { %1575 = vmatpush3.bf16.msra.mxu1 %v1728_v2  ;;  %1554 = vmatprep.subr.bf16.mxu0 %v1729_v4  ;;  %p1876_p12 = pneg %p1875_p8 }
  0xc3   : > { %1576 = vmatprep.subr.bf16.mxu1 %v1730_v6  ;;  %1172 = vmatprep.mubr.bf16.mxu0 %v498_v3 }
  0xc4   : > { %1213 = vmatprep.mubr.bf16.mxu1 %v500_v5  ;;  %p1883_p6 = pnand %p1882_p3, %p1876_p12 }
  0xc5   : > { %1555 = vmatpush3.bf16.msra.mxu0 %v1731_v7 }
  0xc6   : > { %1577 = vmatpush3.bf16.msra.mxu1 %v1732_v8  ;;  %1556 = vmatprep.subr.bf16.mxu0 %v1733_v9  ;;  %v1240_v8 = vrot.slane %v1235_v59, %v569_v33 }
  0xc7   : > { %1578 = vmatprep.subr.bf16.mxu1 %v1734_v10 }
  0xc9   : > { %1557 = vmatpush3.bf16.msra.mxu0 %v1735_v11 }
  0xca   : > { %1579 = vmatpush3.bf16.msra.mxu1 %v1736_v12  ;;  %1558 = vmatprep.subr.bf16.mxu0 %v1737_v13 }
  0xcb   : > { %1580 = vmatprep.subr.bf16.mxu1 %v1738_v14 }
  0xcd   : > { %1559 = vmatpush3.bf16.msra.mxu0 %v1739_v15 }
  0xce   : > { %1581 = vmatpush3.bf16.msra.mxu1 %v1740_v16  ;;  %1560 = vmatprep.subr.bf16.mxu0 %v1741_v17 }
  0xcf   : > { %1582 = vmatprep.subr.bf16.mxu1 %v1742_v18 }
  0xd1   : > { %1561 = vmatpush3.bf16.msra.mxu0 %v1743_v19 }
  0xd2   : > { %1583 = vmatpush3.bf16.msra.mxu1 %v1744_v20  ;;  %1562 = vmatprep.subr.bf16.mxu0 %v1745_v21 }
  0xd3   : > { %1584 = vmatprep.subr.bf16.mxu1 %v1746_v22 }
  0xd5   : > { %1563 = vmatpush3.bf16.msra.mxu0 %v1747_v23 }
  0xd6   : > { %1585 = vmatpush3.bf16.msra.mxu1 %v1748_v25  ;;  %1564 = vmatprep.subr.bf16.mxu0 %v1749_v26 }
  0xd7   : > { %1586 = vmatprep.subr.bf16.mxu1 %v1750_v27 }
  0xd9   : > { %1565 = vmatpush3.bf16.msra.mxu0 %v1751_v28 }
  0xda   : > { %1587 = vmatpush3.bf16.msra.mxu1 %v1752_v29  ;;  %1566 = vmatprep.subr.bf16.mxu0 %v1753_v30 }
  0xdb   : > { %1588 = vmatprep.subr.bf16.mxu1 %v1754_v31 }
  0xdd   : > { %1567 = vmatpush3.bf16.msra.mxu0 %v1755_v32 }
  0xde   : > { %1589 = vmatpush3.bf16.msra.mxu1 %v1756_v34 }
  0xe0   : > { %1173 = vmatmul.mubr.bf16.vlgmr.msra.gmra.mrb[4].mxu0 %v497_v35 }
  0xe1   : > { %1214 = vmatmul.mubr.bf16.vlgmr.msra.gmra.mrb[4].mxu1 %v499_v36 }
 0x193   : > { %v1524_v37 = vpop.f32.mrb[0].mxu0 }
 0x194   : > { %v1546_v38 = vpop.f32.mrb[0].mxu1  ;;  %v1525_v39 = vpop.f32.mrb[1].mxu0 }
 0x195   : > { %v1526_v40 = vadd.f32 %v1525_v39, %v1524_v37  ;;  %v1547_v41 = vpop.f32.mrb[1].mxu1  ;;  %v1527_v42 = vpop.f32.mrb[2].mxu0 }
 0x196   : > { %v1548_v43 = vadd.f32 %v1547_v41, %v1546_v38  ;;  %v1549_v44 = vpop.f32.mrb[2].mxu1  ;;  %v1528_v46 = vpop.f32.mrb[3].mxu0 }
 0x197   : > { %v1529_v47 = vadd.f32 %v1528_v46, %v1527_v42  ;;  %v1550_v45 = vpop.f32.mrb[3].mxu1 }
 0x198   : > { %v931_v48 = vadd.f32 %v1548_v43, %v1526_v40  ;;  %v1551_v49 = vadd.f32 %v1550_v45, %v1549_v44 }
 0x19a   : > { %v934_v50 = vadd.f32 %v1551_v49, %v1529_v47  ;;  %v946_v60 = vmul.f32 %v1471_v55, %v931_v48 }
 0x19c   : > { %v947_v4 = vmul.f32 %v1471_v55, %v934_v50 }
 0x1b3   : > { %v1568_v56 = vpop.f32.mrb[4].mxu0 }
 0x1b4   : > { %v1590_v57 = vpop.f32.mrb[4].mxu1  ;;  %v1569_v58 = vpop.f32.mrb[5].mxu0 }
 0x1b5   : > { %v1570_v61 = vadd.f32 %v1569_v58, %v1568_v56  ;;  %v1591_v62 = vpop.f32.mrb[5].mxu1  ;;  %v1571_v63 = vpop.f32.mrb[6].mxu0 }
 0x1b6   : > { %v1592_v0 = vadd.f32 %v1591_v62, %v1590_v57  ;;  %v1593_v1 = vpop.f32.mrb[6].mxu1  ;;  %v1572_v2 = vpop.f32.mrb[7].mxu0 }
 0x1b7   : > { %v1175_v3 = vadd.f32 %v1570_v61, %v946_v60  ;;  %v1573_v5 = vadd.f32 %v1572_v2, %v1571_v63  ;;  %v1594_v6 = vpop.f32.mrb[7].mxu1 }
 0x1b8   : > { %v1595_v7 = vadd.f32 %v1594_v6, %v1593_v1 }
 0x1b9   : > { %v1216_v9 = vadd.f32 %v1592_v0, %v1175_v3  ;;  %v1178_v10 = vadd.f32 %v1573_v5, %v947_v4 }
 0x1bb   : > { %v1219_v11 = vadd.f32 %v1595_v7, %v1178_v10  ;;  %v1242_v12 = vadd.f32 %v1240_v8, %v1216_v9 }
 0x1bd   : > { %1244 = vst [vmem:[%s465_s26] sm:$0xff] %v1242_v12  ;;  %v1243_v24 = vadd.f32 %v1240_v8, %v1219_v11 }
 0x1bf   : > { %1245 = vst [vmem:[%s465_s26 + $0x8] sm:$0xff] %v1243_v24 }
 0x1c0   : > { %1886 = shalt.err (!%p1883_p6)
}
 0x1c1   : > { %s1887_s14 = scalar_lea.hbm %s2384_s13, 256  ;;  %s1891_s20 = scalar_lea.hbm %s2494_s15, 768 }
 0x1c2   : > { %p1888_p1 = scmp.ne.s32.totalorder %s2384_s13, %s1887_s14  ;;  %p1892_p4 = scmp.lt.u32.totalorder %s2384_s13, %s2494_s15 }
 0x1c3   : > { %p1893_p2 = scmp.lt.u32.totalorder %s1891_s20, %s1887_s14  ;;  %p1895_p13 = scmp.lt.u32.totalorder %s1887_s14, %s2384_s13 }
 0x1c4   : > { %p1889_p7 = pnand %p1888_p1, %p2495_p10 }
 0x1c5   : > { %p1894_p11 = por %p1893_p2, %p1892_p4 }
 0x1c6   : > { %p1890_p9 = pneg %p1889_p7 }
 0x1c7   : > { %p1896_p8 = por %p1895_p13, %p1894_p11 }
 0x1c9   : > { %p1897_p12 = pnand %p1896_p8, %p1890_p9 }
 0x1cb   : > { %1900 = shalt.err (!%p1897_p12)
}
 0x1cc   : > { %s1975_s27 = smov 128   ;;  %s1976_s25 = smov 384  }
 0x1cd   : > { %s1977_s24 = smov 8  }
 0x1ce   : > { %1608 = dma.vmem_to_hbm [thread:$0]  (%p2495_p10), %s2386_s16, 256, %s2384_s13, %s1247_s0, %s1975_s27, %s1976_s25, %s1977_s24  }
 0x1cf PF: > { %s2496_s8 = sld [smem:[#allocation14_spill]]  ;;  %s2497_s18 = sld [smem:[#allocation16_spill]] }
 0x1d0   : > { %p1633_p0 = scmp.ge.s32.totalorder %s1963_s10, 2 }
 0x1d5   : > { %s1274_s26 = sand.u32 1, %s2496_s8   ;;  %p2498_p5 = scmp.ne.s32.totalorder %s2497_s18, 0 }
 0x1d6   : > { %s1275_s12 = scalar_lea.sflag [#allocation4], %s1274_s26 }
 0x1d7   : > { %p1625_p3 = pnand %p1633_p0, %p2498_p5 }
 0x1d9   : > { %1938 = dma.done.wait (!%p1625_p3), %s1275_s12, 256  }
 0x1da   : > { %1940 = vsyncadd (!%p1625_p3), %s1275_s12, 4294967040  ;;  %s23_s10 = sadd.s32 1, %s1963_s10   ;;  %s2499_s11 = sld [smem:[#allocation18_spill]] }
 0x1db   : > { %p20_p6 = scmp.ge.s32.totalorder %s23_s10, 5   ;;  %s2500_s17 = sld [smem:[#allocation17_spill]] }
 0x1dc   : > { %s2501_s27 = smov %s1947_s28  ;;  %s2502_s28 = smov %s1951_s29 }
 0x1dd   : > { %s2504_s30 = smov %s1959_s9  ;;  %22 = sbr.rel (!%p20_p6) target bundleno = 13 (0xd), region = 137 }
 0x1e0   : > { %s2503_s29 = smov %s2499_s11 }
 0x1e1   : > { %s2505_s9 = smov %s2500_s17 }
 0x1e4   :  { %1280 = vsyncpa [#allocation3], 1 }
 0x1e5   :  { %1282 = vsyncpa [#allocation3 + $0x1], 1 }
 0x1e6   :  { %1283 = vsyncpa [#allocation6], 1 }
 0x1e7   :  { %1284 = vsyncpa [#allocation4], 1 }
 0x1e8   :  { %1286 = vsyncpa [#allocation4 + $0x1], 1 }

</bundles_post_ra>
